<compile_context>
chip_gen: v6e
topology: v6e:2x2x1
jax: 0.10.0
libtpu: 0.0.40
codegen_flags: <defaults>
</compile_context>

<pallas_src>
import math

import jax
import jax.numpy as jnp
from jax.experimental import pallas as pl
from jax.experimental.pallas import tpu as pltpu


def pathformer_kernel(x_ref, p_ref, o_ref):
    # x_ref: (TB, T*N)      raw input block, (T, N) collapsed row-major (free reshape)
    # p_ref: (P+1, T*N + 2) packed fused params:
    #          rows 0..P-1 : [ W_eff scattered on last-node lanes | 1-sum(W) | b_eff ]
    #          row  P      : [ 1/T at last-node lanes, 0 elsewhere |    0    |   0   ]
    # o_ref: (TB, P)        final output block (last-node slice of the denormed pred)
    TN = x_ref.shape[1]
    P = o_ref.shape[1]

    x = x_ref[...]                                            # [TB, T*N]

    # --- RevIN statistics of the last node's series ------------------------------
    # m_row is 1/T on the last node's lanes, 0 elsewhere, so plain lane-sums give the
    # mean and E[x^2] (population variance / unbiased=False, eps=1e-5) with no
    # in-kernel gather or slice of the node column.
    m_row = p_ref[P:P + 1, :TN]                               # [1, T*N]
    mean = jnp.sum(x * m_row, axis=-1, keepdims=True)         # [TB, 1]
    ex2 = jnp.sum(x * x * m_row, axis=-1, keepdims=True)      # [TB, 1]
    stdev = jnp.sqrt(ex2 - mean * mean + 1e-5)                # [TB, 1]

    # TODO(synk): AMS (adaptive mixture-of-experts transformer stack) is not defined in
    # the provided reference source; treated as an identity pass-through.  All of the
    # folding below is only valid under that assumption.

    # --- fused start_fc + projections with RevIN folded around them ---------------
    #   out[b,p] = sum_j x[b,j]*W[p,j] + mean[b]*(1 - sum_j W[p,j]) + stdev[b]*b_eff[p]
    w = p_ref[:P, :TN]                                        # [P, T*N]
    c_mean = p_ref[:P, TN:TN + 1]                             # [P, 1]
    c_std = p_ref[:P, TN + 1:TN + 2]                          # [P, 1]
    if P == 1:
        # Tiny contraction: VPU broadcast-multiply + XLU lane reduce (MXU cannot be
        # filled by an N=1 matmul).  Everything stays 2-D; no relayouts.
        y = jnp.sum(x * w, axis=-1, keepdims=True)            # [TB, 1]
        o_ref[...] = y + mean * c_mean + stdev * c_std
    else:
        # Larger pred_len: put the contraction on the MXU.
        y = jax.lax.dot_general(x, w, (((1,), (1,)), ((), ())),
                                preferred_element_type=jnp.float32)   # [TB, P]
        o_ref[...] = y + mean * jnp.transpose(c_mean) + stdev * jnp.transpose(c_std)


def fuse_pathformer_params(w0, b0, wp, bp, num_nodes):
    """Fold start_fc (Linear 1->D), projections (Linear T*D -> P), the RevIN
    norm/denorm re-association and the last-node selection into one packed buffer.

    Host-side, run once at parameter-setup time (not part of the per-forward path).
    Exact while the AMS stack is identity:
      W_eff[p, t] = sum_d wp[p, t*D + d] * w0[d]
      b_eff[p]    = sum_{t,d} wp[p, t*D + d] * b0[d] + bp[p]
      out[b, p]   = sum_t x_last[b, t] * W_eff[p, t]
                    + mean[b] * (1 - sum_t W_eff[p, t]) + stdev[b] * b_eff[p]
    Returns a single [P+1, T*N+2] array:
      rows 0..P-1: W_eff scattered onto the last-node lanes of the flattened (T*N)
                   input, then the two fold coefficients (1 - sum W_eff) and b_eff.
      row  P:      the mean-mask row (1/T at the last-node lanes).
    """
    P, TD = wp.shape
    D = w0.shape[-1]
    T = TD // D
    N = num_nodes
    w0v = w0.reshape(D).astype(jnp.float32)
    b0v = b0.reshape(D).astype(jnp.float32)
    wp_ptd = wp.reshape(P, T, D).astype(jnp.float32)
    w_eff = jnp.einsum("ptd,d->pt", wp_ptd, w0v)                      # [P, T]
    b_eff = jnp.einsum("ptd,d->p", wp_ptd, b0v) + bp.reshape(P)       # [P]
    c_mean = 1.0 - jnp.sum(w_eff, axis=1)                             # [P]
    # Scatter onto the flattened (T*N) lane layout at the last-node positions.
    w_flat = jnp.zeros((P, T * N), jnp.float32).at[:, (N - 1)::N].set(w_eff)
    m_row = jnp.zeros((1, T * N), jnp.float32).at[:, (N - 1)::N].set(1.0 / T)
    top = jnp.concatenate([w_flat, c_mean[:, None], b_eff[:, None]], axis=1)
    bot = jnp.concatenate([m_row, jnp.zeros((1, 2), jnp.float32)], axis=1)
    return jnp.concatenate([top, bot], axis=0)                        # [P+1, T*N+2]


@jax.jit
def pathformer_forward(x, packed):
    """x: [B, T, N] f32; packed: [P+1, T*N+2] fused params. Returns [B, pred_len]."""
    B, T, N = x.shape
    P = packed.shape[0] - 1
    assert packed.shape[1] == T * N + 2
    # Free row-major collapse (no data movement); the kernel sees all nodes and the
    # packed parameters do the last-node selection, so there is no host-side slice.
    xf = x.reshape(B, T * N)
    # Tile the batch: keeps VMEM bounded as B grows and lets the "parallel" grid axis
    # shard across both TensorCores on v7x.  One step at the module's default B.
    tb = min(B, 256)
    grid = (pl.cdiv(B, tb),)
    return pl.pallas_call(
        pathformer_kernel,
        out_shape=jax.ShapeDtypeStruct((B, P), jnp.float32),
        grid=grid,
        in_specs=[
            pl.BlockSpec((tb, T * N), lambda i: (i, 0)),
            pl.BlockSpec((P + 1, T * N + 2), lambda i: (0, 0)),
        ],
        out_specs=pl.BlockSpec((tb, P), lambda i: (i, 0)),
        compiler_params=pltpu.CompilerParams(
            dimension_semantics=("parallel",),
        ),
    )(xf, packed)


def pathformer_reference(x, w0, b0, wp, bp):
    """Pure-JAX reference of the original (unfused, all-node) forward, AMS = identity."""
    B, T, N = x.shape
    D = w0.shape[-1]
    P = wp.shape[0]
    mean = jnp.mean(x, axis=1, keepdims=True)                         # [B, 1, N]
    stdev = jnp.sqrt(jnp.var(x, axis=1, keepdims=True) + 1e-5)        # population var
    xn = (x - mean) / stdev
    h = xn[..., None] * w0[None, None, :, :] + b0[None, None, :, :]   # [B, T, N, D]
    h = jnp.transpose(h, (0, 2, 1, 3)).reshape(B, N, T * D)           # [B, N, T*D]
    y = h @ wp.T + bp                                                 # [B, N, P]
    y = jnp.transpose(y, (0, 2, 1))                                   # [B, P, N]
    y = y * stdev + mean
    return y[:, :, -1].reshape(B, P)


if __name__ == "__main__":
    # Module-default shapes: batch=2, seq_len=24, num_nodes=15, d_model=16, pred_len=1.
    B, T, N, D, P = 2, 24, 15, 16, 1

    key = jax.random.PRNGKey(0)
    k1, k2, k3, k4, k5 = jax.random.split(key, 5)
    x = jax.random.normal(k1, (B, T, N), dtype=jnp.float32)

    # Deterministic synthetic parameters with the torch module's shapes.
    w0 = jax.random.uniform(k2, (1, D), jnp.float32, -1.0, 1.0)          # start_fc.weight.T
    b0 = jax.random.uniform(k3, (1, D), jnp.float32, -1.0, 1.0)          # start_fc.bias
    bound = 1.0 / math.sqrt(T * D)
    wp = jax.random.uniform(k4, (P, T * D), jnp.float32, -bound, bound)  # projections.weight
    bp = jax.random.uniform(k5, (1, P), jnp.float32, -bound, bound)      # projections.bias

    # One-time parameter fusion (hoisted out of the per-forward path).
    packed = jax.block_until_ready(fuse_pathformer_params(w0, b0, wp, bp, N))

    out = jax.block_until_ready(pathformer_forward(x, packed))

    ref = pathformer_reference(x, w0, b0, wp, bp)
    assert out.shape == (B, P), out.shape
    assert jnp.allclose(out, ref, atol=1e-4, rtol=1e-4), (out, ref)
    print("KERNEL_OK")
</pallas_src>

<mosaic_0001>
module attributes {stable_mosaic.version = 11 : i64} {
  func.func @pathformer_kernel(%arg0: i32, %arg1: memref<2x360xf32, #tpu.memory_space<vmem>>, %arg2: memref<2x362xf32, #tpu.memory_space<vmem>>, %arg3: memref<2x1xf32, #tpu.memory_space<vmem>>) attributes {dimension_semantics = [#tpu.dimension_semantics<parallel>], iteration_bounds = array<i64: 1>, scalar_prefetch = 0 : i64, scratch_operands = 0 : i64, tpu.core_type = #tpu.core_type<tc>, window_params = [{transform_indices = @transform_0, window_bounds = array<i64: 2, 360>}, {pipeline_mode = #tpu.pipeline_mode<synchronous>, transform_indices = @transform_1, window_bounds = array<i64: 2, 362>}, {transform_indices = @transform_2, window_bounds = array<i64: 2, 1>}]} {
    %c0 = arith.constant 0 : index
    %c0_0 = arith.constant 0 : index
    %0 = vector.load %arg1[%c0, %c0_0] : memref<2x360xf32, #tpu.memory_space<vmem>>, vector<2x360xf32>
    %c1 = arith.constant 1 : index
    %c0_1 = arith.constant 0 : index
    %1 = vector.load %arg2[%c1, %c0_1] : memref<2x362xf32, #tpu.memory_space<vmem>>, vector<1x360xf32>
    %2 = vector.broadcast %1 : vector<1x360xf32> to vector<2x360xf32>
    %3 = arith.mulf %0, %2 : vector<2x360xf32>
    %cst = arith.constant dense<0.000000e+00> : vector<2xf32>
    %4 = vector.multi_reduction <add>, %3, %cst [1] : vector<2x360xf32> to vector<2xf32>
    %5 = vector.shape_cast %4 : vector<2xf32> to vector<2x1xf32>
    %6 = arith.mulf %0, %0 : vector<2x360xf32>
    %7 = vector.broadcast %1 : vector<1x360xf32> to vector<2x360xf32>
    %8 = arith.mulf %6, %7 : vector<2x360xf32>
    %cst_2 = arith.constant dense<0.000000e+00> : vector<2xf32>
    %9 = vector.multi_reduction <add>, %8, %cst_2 [1] : vector<2x360xf32> to vector<2xf32>
    %10 = vector.shape_cast %9 : vector<2xf32> to vector<2x1xf32>
    %11 = arith.mulf %5, %5 : vector<2x1xf32>
    %12 = arith.subf %10, %11 : vector<2x1xf32>
    %cst_3 = arith.constant 9.99999974E-6 : f32
    %13 = vector.broadcast %cst_3 : f32 to vector<2x1xf32>
    %14 = arith.addf %12, %13 : vector<2x1xf32>
    %15 = math.sqrt %14 : vector<2x1xf32>
    %c0_4 = arith.constant 0 : index
    %c0_5 = arith.constant 0 : index
    %16 = vector.load %arg2[%c0_4, %c0_5] : memref<2x362xf32, #tpu.memory_space<vmem>>, vector<1x360xf32>
    %c0_6 = arith.constant 0 : index
    %c360 = arith.constant 360 : index
    %17 = vector.load %arg2[%c0_6, %c360] : memref<2x362xf32, #tpu.memory_space<vmem>>, vector<1x1xf32>
    %c0_7 = arith.constant 0 : index
    %c361 = arith.constant 361 : index
    %18 = vector.load %arg2[%c0_7, %c361] : memref<2x362xf32, #tpu.memory_space<vmem>>, vector<1x1xf32>
    %19 = vector.broadcast %16 : vector<1x360xf32> to vector<2x360xf32>
    %20 = arith.mulf %0, %19 : vector<2x360xf32>
    %cst_8 = arith.constant dense<0.000000e+00> : vector<2xf32>
    %21 = vector.multi_reduction <add>, %20, %cst_8 [1] : vector<2x360xf32> to vector<2xf32>
    %22 = vector.shape_cast %21 : vector<2xf32> to vector<2x1xf32>
    %23 = vector.broadcast %17 : vector<1x1xf32> to vector<2x1xf32>
    %24 = arith.mulf %5, %23 : vector<2x1xf32>
    %25 = arith.addf %22, %24 : vector<2x1xf32>
    %26 = vector.broadcast %18 : vector<1x1xf32> to vector<2x1xf32>
    %27 = arith.mulf %15, %26 : vector<2x1xf32>
    %28 = arith.addf %25, %27 : vector<2x1xf32>
    %c0_9 = arith.constant 0 : index
    %c0_10 = arith.constant 0 : index
    %29 = vector.load %arg3[%c0_9, %c0_10] : memref<2x1xf32, #tpu.memory_space<vmem>>, vector<2x1xf32>
    tpu.vector_store %arg3[%c0_9, %c0_10], %28 {strides = array<i32>} : memref<2x1xf32, #tpu.memory_space<vmem>>, vector<2x1xf32>,
    return
  }
  func.func @transform_0(%arg0: i32) -> (i32, i32) {
    %c0_i32 = arith.constant 0 : i32
    %c0_i32_0 = arith.constant 0 : i32
    return %arg0, %c0_i32 : i32, i32
  }
  func.func @transform_1(%arg0: i32) -> (i32, i32) {
    %c0_i32 = arith.constant 0 : i32
    %c0_i32_0 = arith.constant 0 : i32
    %c0_i32_1 = arith.constant 0 : i32
    return %c0_i32, %c0_i32_0 : i32, i32
  }
  func.func @transform_2(%arg0: i32) -> (i32, i32) {
    %c0_i32 = arith.constant 0 : i32
    %c0_i32_0 = arith.constant 0 : i32
    return %arg0, %c0_i32 : i32, i32
  }
}

</mosaic_0001>

<bundles_post_ra>
// kernel: pathformer_forward.1
= control target key start
LH: loop header
LB: loop body
LE: loop exit
PB: predicated region body
PF: predicated region fallthrough
CT: control target
= control target key end

     0   :  { %v15_v0 = vlaneseq  ;;  %v202_v1 = vmov 1983009808   ;;  %vm65_vm0 = vcmask 1041408   ;;  %vm69_vm1 = vcmask 844800   ;;  %s203_s16 = smov 127   ;;  %s244_s1 = inlined_call_operand.vmem [shape: f32[2,362], index: 1, kind: input, shape index: {}]   ;;  %s245_s0 = inlined_call_operand.vmem [shape: f32[2,360], index: 0, kind: input, shape index: {}]   ;;  %s246_s2 = inlined_call_operand.vmem [shape: f32[2,1], index: 2, kind: output, shape index: {}]  }
   0x1   :  { %v29_v2 = vunpack.c.l.s4 %v202_v1  ;;  %v195_v4 = vld [vmem:[%s244_s1 + $0x1] ss:$2 sm:$0x7]  ;;  %v113_v6 = vld [vmem:[%s244_s1] ss:$2 sm:$0x7] }
   0x2   :  { %v16_v3 = vshrl.u32 %v15_v0, 7  ;;  %v11_v19 = vld [vmem:[%s245_s0] sm:$0x3f]  ;;  %vm189_vm4 = vcmask 1024  }
   0x3   :  { %v30_v5 = vunpack.c.0.s8 %v29_v2  ;;  %v74_v23 = vmul.f32 %v11_v19, %v11_v19  ;;  %v196_v57 = vld [vmem:[%s244_s1 + $0x4] ss:$0 sm:$0xff]  ;;  %s204_s1 = smov 24  }
   0x4   :  { %v17_v7 = vsub.s32 0, %v16_v3  ;;  %v21_v8 = vsub.s32 1, %v16_v3  ;;  %v25_v9 = vsub.s32 2, %v16_v3 }
   0x5   :  { %v33_v10 = vsub.s32 %v30_v5, %v16_v3 }
   0x6   :  { %v18_v11 = vrot.slane %v195_v4, %v17_v7  ;;  %v22_v12 = vrot.slane %v195_v4, %v21_v8  ;;  %v26_v13 = vrot.slane %v195_v4, %v25_v9  ;;  %v119_v14 = vrot.slane %v113_v6, %v17_v7 }
   0x7   :  { %v123_v15 = vrot.slane %v113_v6, %v21_v8  ;;  %v127_v16 = vrot.slane %v113_v6, %v25_v9 }
   0x8   :  { %v27_v17 = vcombine.low %v18_v11, %v22_v12  ;;  %v41_v18 = vrot.slane %v26_v13, %v33_v10 }
   0x9   :  { %v128_v20 = vcombine.low %v119_v14, %v123_v15  ;;  %v142_v21 = vrot.slane %v127_v16, %v33_v10 }
   0xa   :  { %v34_v22 = vrot.slane %v27_v17, %v33_v10 }
   0xb   :  { %v135_v24 = vrot.slane %v128_v20, %v33_v10 }
   0xc   :  { %v42_v25 = vcombine.low %v34_v22, %v41_v18 }
   0xd   :  { %v143_v26 = vcombine.low %v135_v24, %v142_v21 }
   0xe   :  { %v44_v27 = vmul.f32 %v42_v25, %v11_v19  ;;  %v75_v28 = vmul.f32 %v74_v23, %v42_v25 }
   0xf   :  { %v145_v29 = vmul.f32 %v143_v26, %v11_v19 }
  0x10   :  { %v46_v30 = vcombine.high %v44_v27, %v44_v27  ;;  %v53_v31 = vrot.slane %v44_v27, %v33_v10  ;;  %v77_v32 = vcombine.high %v75_v28, %v75_v28  ;;  %v84_v33 = vrot.slane %v75_v28, %v33_v10 }
  0x11   :  { %v147_v34 = vcombine.high %v145_v29, %v145_v29  ;;  %v154_v35 = vrot.slane %v145_v29, %v33_v10 }
  0x12   :  { %v60_v36 = vrot.slane %v46_v30, %v33_v10  ;;  %v61_v37 = vcombine.high %v53_v31, %v53_v31  ;;  %v66_v38 = vsel %vm65_vm0, %v53_v31, 0.0  ;;  %v91_v39 = vrot.slane %v77_v32, %v33_v10 }
  0x13   :  { %v161_v40 = vrot.slane %v147_v34, %v33_v10  ;;  %v162_v41 = vcombine.high %v154_v35, %v154_v35  ;;  %v166_v42 = vsel %vm65_vm0, %v154_v35, 0.0  ;;  %v92_v43 = vcombine.high %v84_v33, %v84_v33 }
  0x14   :  { %v67_v44 = vsel %vm65_vm0, %v61_v37, 0.0  ;;  %v70_v45 = vsel %vm69_vm1, %v60_v36, 0.0  ;;  %v96_v46 = vsel %vm65_vm0, %v84_v33, 0.0  ;;  %v99_v53 = vsel %vm69_vm1, %v91_v39, 0.0 }
  0x15   :  { %v68_v47 = vadd.f32 %v67_v44, %v66_v38  ;;  %v167_v48 = vsel %vm65_vm0, %v162_v41, 0.0  ;;  %v169_v49 = vsel %vm69_vm1, %v161_v40, 0.0  ;;  %v97_v50 = vsel %vm65_vm0, %v92_v43, 0.0 }
  0x16   :  { %v168_v51 = vadd.f32 %v167_v48, %v166_v42  ;;  %v98_v52 = vadd.f32 %v97_v50, %v96_v46 }
  0x17   :  { %v71_v54 = vadd.f32 %v70_v45, %v68_v47 }
  0x18   :  { %v170_v55 = vadd.f32 %v169_v49, %v168_v51  ;;  %v100_v56 = vadd.f32 %v99_v53, %v98_v52 }
  0x19   :  { %72 = vadd.xlane.f32.xlu0 %v71_v54 }
  0x1a   :  { %171 = vadd.xlane.f32.xlu1 %v170_v55 }
  0x1d   :  { %101 = vadd.xlane.f32.xlu0 %v100_v56 }
  0xa2   :  { %v73_v58 = vpop.xlane.xlu0 %72 }
  0xa3   :  { %v177_v59 = vmul.f32 %v196_v57, %v73_v58  ;;  %v103_v60 = vmul.f32 %v73_v58, %v73_v58  ;;  %v172_v6 = vpop.xlane.xlu1 %171 }
  0xa5   :  { %v178_v7 = vadd.f32 %v177_v59, %v172_v6 }
  0xa6   :  { %v102_v61 = vpop.xlane.xlu0 %101 }
  0xa7   :  { %v104_v62 = vsub.f32 %v102_v61, %v103_v60 }
  0xa9   :  { %v105_v63 = vadd.f32 1e-05, %v104_v62 }
  0xab   :  { %200 = vrsqrt.f32 %v105_v63  ;;  %vm108_vm2 = vcmp.eq.f32.partialorder %v105_v63, inf  ;;  %v111_v2 = vand.u32 2147483648, %v105_v63  ;;  %vm110_vm3 = vcmp.eq.f32.partialorder %v105_v63, 0.0 }
  0xb8   :  { %v201_v0 = vpop.eup %200 }
  0xb9   :  { %v107_v1 = vmul.f32 %v201_v0, %v105_v63 }
  0xbb   :  { %v109_v3 = vsel %vm108_vm2, %v105_v63, %v107_v1 }
  0xbc   :  { %v112_v4 = vsel %vm110_vm3, %v111_v2, %v109_v3 }
  0xbd   :  { %v179_v5 = vmul.f32 %v196_v57, %v112_v4 }
  0xbf   :  { %181 = vrot.lane.b32.xlu1 %v179_v5, %s203_s16 }
 0x131   :  { %v182_v8 = vpop.permute.xlu1 %181 }
 0x132   :  { %v184_v9 = vadd.f32 %v182_v8, %v178_v7 }
 0x134   :  { %186 = vrot.lane.b32.xlu0 %v184_v9, %s204_s1 }
 0x1a6   :  { %v187_v10 = vpop.permute.xlu0 %186 }
 0x1a7   :  { %190 = vst.msk [vmem:[%s246_s2] sm:$0x3] %vm189_vm4, %v187_v10 }

</bundles_post_ra>
